<compile_context>
chip_gen: v7x
topology: tpu7x:2x2x1
jax: 0.10.0
libtpu: 0.0.40
codegen_flags: <defaults>
</compile_context>

<pallas_src>
import jax
import jax.numpy as jnp
from jax.experimental import pallas as pl
from jax.experimental.pallas import tpu as pltpu

LN_EPS = 1e-5


def _autoencoder_kernel(
    x_ref,
    w1, b1, w2, b2, w3, b3, w4, b4,          # encoder linears
    w5, b5, w6, b6, w7, b7, w8, b8,          # decoder linears
    ln3_w, ln3_b, ln2_w, ln2_b,              # LayerNorm(32), LayerNorm(64)
    o_ref,
):
    x = x_ref[...].astype(jnp.float32)       # single cast (no-op for f32 I/O)

    def linear(h, w_ref_, b_ref_):
        # MXU matmul, f32 accumulate; bias broadcast over batch rows.
        return jnp.dot(h, w_ref_[...], preferred_element_type=jnp.float32) + b_ref_[...]

    def relu(h):
        return jnp.maximum(h, 0.0)

    def layer_norm(h, g_ref, b_ref_):
        mu = jnp.mean(h, axis=-1, keepdims=True)
        var = jnp.mean(jnp.square(h - mu), axis=-1, keepdims=True)
        # rsqrt lowers to the EUP slot (off the VALU critical path).
        return (h - mu) * jax.lax.rsqrt(var + LN_EPS) * g_ref[...] + b_ref_[...]

    # ---- encoder ----
    enc1_out = relu(linear(x, w1, b1))          # (TB, 128)
    enc2_out = relu(linear(enc1_out, w2, b2))   # (TB, 64)
    enc3_out = relu(linear(enc2_out, w3, b3))   # (TB, 32)
    encoding = linear(enc3_out, w4, b4)         # (TB, 16)

    # Dropout(p=0.2) -> identity at inference.
    drop = encoding

    # ---- decoder with skip connections ----
    dec1_out = relu(linear(drop, w5, b5))                       # (TB, 32)
    dec2_in = layer_norm(dec1_out + enc3_out, ln3_w, ln3_b)     # LayerNorm(32)
    dec2_out = relu(linear(dec2_in, w6, b6))                    # (TB, 64)
    dec3_in = layer_norm(dec2_out + enc2_out, ln2_w, ln2_b)     # LayerNorm(64)
    dec3_out = relu(linear(dec3_in, w7, b7))                    # (TB, 128)
    dec4_in = dec3_out + enc1_out
    out = linear(dec4_in, w8, b8)                               # (TB, D)

    o_ref[...] = out.astype(o_ref.dtype)


def _choose_batch_tile(B: int) -> int:
    """Batch tile: sublane-aligned for small B; 512 (multiple of 128) otherwise.

    512 keeps double-buffered (tb, D) f32 in/out tiles + ~1 KB/row of live skip
    activations comfortably inside every generation's scoped VMEM, fills the
    MXU rows, and (for B >= 1024) gives a multi-step grid that pipelines and
    shards across v7x's two TensorCores.
    """
    if B <= 512:
        return max(8, ((B + 7) // 8) * 8)
    return 512


def autoencoder_forward(x, params, *, tb=None, vmem_limit_bytes=None):
    """x: (B, D). params: weights stored (in, out); biases / LN params (1, out).

    Output dtype matches x.dtype (pass bf16 x for bf16 I/O; math stays f32).
    """
    B, D = x.shape
    if tb is None:
        tb = _choose_batch_tile(B)
    assert tb % 8 == 0, "batch tile must be a sublane multiple"

    # Never drop trailing rows: pad the batch up to a multiple of tb and slice
    # the result back down.  Padded (all-zero) rows are numerically benign
    # (LayerNorm of zeros -> zeros) and are discarded.
    num_steps = pl.cdiv(B, tb)
    B_pad = num_steps * tb
    x_in = jnp.pad(x, ((0, B_pad - B), (0, 0))) if B_pad != B else x

    weight_args = (
        params["w1"], params["b1"], params["w2"], params["b2"],
        params["w3"], params["b3"], params["w4"], params["b4"],
        params["w5"], params["b5"], params["w6"], params["b6"],
        params["w7"], params["b7"], params["w8"], params["b8"],
        params["ln3_w"], params["ln3_b"], params["ln2_w"], params["ln2_b"],
    )

    if vmem_limit_bytes is None:
        # Double-buffered (tb, D) in/out tiles + live activations
        # (~(464 + D) f32 per row) + resident weights, with ~2x headroom.
        # Capped at 48 MiB so it fits v7x's 64 MiB physical VMEM.
        weight_bytes = sum(int(a.size) * 4 for a in weight_args)
        per_row_bytes = (2 * 2 * D) * 4 + (464 + D) * 4
        est = 2 * tb * per_row_bytes + weight_bytes + (1 << 20)
        vmem_limit_bytes = int(min(48 << 20, max(16 << 20, est)))

    def full_spec(arr):
        # Whole-array block with a constant index map: Pallas keeps the block
        # resident in VMEM across grid steps (no per-step weight re-DMA).
        return pl.BlockSpec(arr.shape, lambda i: (0,) * arr.ndim)

    in_specs = [pl.BlockSpec((tb, D), lambda i: (i, 0))] + [full_spec(a) for a in weight_args]
    out_specs = pl.BlockSpec((tb, D), lambda i: (i, 0))

    out = pl.pallas_call(
        _autoencoder_kernel,
        out_shape=jax.ShapeDtypeStruct((B_pad, D), x.dtype),
        grid=(num_steps,),
        in_specs=in_specs,
        out_specs=out_specs,
        compiler_params=pltpu.CompilerParams(
            dimension_semantics=("parallel",),
            vmem_limit_bytes=vmem_limit_bytes,
        ),
    )(x_in, *weight_args)

    return out[:B] if B_pad != B else out


def init_params(key, input_dim):
    """Deterministic synthetic params. Linear weights (in, out); biases (1, out)."""
    dims = [
        ("w1", "b1", input_dim, 128),
        ("w2", "b2", 128, 64),
        ("w3", "b3", 64, 32),
        ("w4", "b4", 32, 16),
        ("w5", "b5", 16, 32),
        ("w6", "b6", 32, 64),
        ("w7", "b7", 64, 128),
        ("w8", "b8", 128, input_dim),
    ]
    params = {}
    keys = jax.random.split(key, 2 * len(dims))
    for idx, (wn, bn, din, dout) in enumerate(dims):
        scale = 1.0 / jnp.sqrt(jnp.float32(din))
        params[wn] = jax.random.uniform(
            keys[2 * idx], (din, dout), jnp.float32, -scale, scale
        )
        params[bn] = jax.random.uniform(
            keys[2 * idx + 1], (1, dout), jnp.float32, -scale, scale
        )
    # LayerNorm params: PyTorch defaults (weight=1, bias=0)
    params["ln3_w"] = jnp.ones((1, 32), jnp.float32)
    params["ln3_b"] = jnp.zeros((1, 32), jnp.float32)
    params["ln2_w"] = jnp.ones((1, 64), jnp.float32)
    params["ln2_b"] = jnp.zeros((1, 64), jnp.float32)
    return params


def reference_forward(x, p):
    """Pure-JAX reference mirroring the PyTorch forward (eval mode)."""
    def lin(h, w, b):
        return h @ w + b

    def ln(h, g, b):
        mu = jnp.mean(h, axis=-1, keepdims=True)
        var = jnp.mean(jnp.square(h - mu), axis=-1, keepdims=True)
        return (h - mu) / jnp.sqrt(var + LN_EPS) * g + b

    e1 = jax.nn.relu(lin(x, p["w1"], p["b1"]))
    e2 = jax.nn.relu(lin(e1, p["w2"], p["b2"]))
    e3 = jax.nn.relu(lin(e2, p["w3"], p["b3"]))
    enc = lin(e3, p["w4"], p["b4"])
    d1 = jax.nn.relu(lin(enc, p["w5"], p["b5"]))
    d2_in = ln(d1 + e3, p["ln3_w"], p["ln3_b"])
    d2 = jax.nn.relu(lin(d2_in, p["w6"], p["b6"]))
    d3_in = ln(d2 + e2, p["ln2_w"], p["ln2_b"])
    d3 = jax.nn.relu(lin(d3_in, p["w7"], p["b7"]))
    return lin(d3 + e1, p["w8"], p["b8"])


if __name__ == "__main__":
    INPUT_DIM = 256
    key = jax.random.PRNGKey(0)
    kx, kp, kx2 = jax.random.split(key, 3)
    params = init_params(kp, INPUT_DIM)

    # Small-batch check (single tile).
    B = 8
    x = jax.random.normal(kx, (B, INPUT_DIM), jnp.float32)
    out = jax.block_until_ready(autoencoder_forward(x, params))
    ref = reference_forward(x, params)
    assert out.shape == (B, INPUT_DIM)
    assert jnp.allclose(out, ref, atol=1e-4, rtol=1e-4), "small-batch mismatch vs JAX reference"

    # Multi-tile check: non-multiple batch exercises padding + pipelined
    # multi-step parallel grid (tb forced small to keep the demo shapes small).
    B2 = 200
    x2 = jax.random.normal(kx2, (B2, INPUT_DIM), jnp.float32)
    out2 = jax.block_until_ready(autoencoder_forward(x2, params, tb=64))
    ref2 = reference_forward(x2, params)
    assert out2.shape == (B2, INPUT_DIM)
    assert jnp.allclose(out2, ref2, atol=1e-4, rtol=1e-4), "tiled-batch mismatch vs JAX reference"

    print("KERNEL_OK")
</pallas_src>

<mosaic_0001>
module attributes {stable_mosaic.version = 11 : i64} {
  func.func @_autoencoder_kernel(%arg0: i32, %arg1: memref<8x256xf32, #tpu.memory_space<vmem>>, %arg2: memref<256x128xf32, #tpu.memory_space<vmem>>, %arg3: memref<1x128xf32, #tpu.memory_space<vmem>>, %arg4: memref<128x64xf32, #tpu.memory_space<vmem>>, %arg5: memref<1x64xf32, #tpu.memory_space<vmem>>, %arg6: memref<64x32xf32, #tpu.memory_space<vmem>>, %arg7: memref<1x32xf32, #tpu.memory_space<vmem>>, %arg8: memref<32x16xf32, #tpu.memory_space<vmem>>, %arg9: memref<1x16xf32, #tpu.memory_space<vmem>>, %arg10: memref<16x32xf32, #tpu.memory_space<vmem>>, %arg11: memref<1x32xf32, #tpu.memory_space<vmem>>, %arg12: memref<32x64xf32, #tpu.memory_space<vmem>>, %arg13: memref<1x64xf32, #tpu.memory_space<vmem>>, %arg14: memref<64x128xf32, #tpu.memory_space<vmem>>, %arg15: memref<1x128xf32, #tpu.memory_space<vmem>>, %arg16: memref<128x256xf32, #tpu.memory_space<vmem>>, %arg17: memref<1x256xf32, #tpu.memory_space<vmem>>, %arg18: memref<1x32xf32, #tpu.memory_space<vmem>>, %arg19: memref<1x32xf32, #tpu.memory_space<vmem>>, %arg20: memref<1x64xf32, #tpu.memory_space<vmem>>, %arg21: memref<1x64xf32, #tpu.memory_space<vmem>>, %arg22: memref<8x256xf32, #tpu.memory_space<vmem>>) attributes {dimension_semantics = [#tpu.dimension_semantics<parallel>], iteration_bounds = array<i64: 1>, scalar_prefetch = 0 : i64, scratch_operands = 0 : i64, tpu.core_type = #tpu.core_type<tc>, window_params = [{transform_indices = @transform_0, window_bounds = array<i64: 8, 256>}, {pipeline_mode = #tpu.pipeline_mode<synchronous>, transform_indices = @transform_1, window_bounds = array<i64: 256, 128>}, {pipeline_mode = #tpu.pipeline_mode<synchronous>, transform_indices = @transform_2, window_bounds = array<i64: 1, 128>}, {pipeline_mode = #tpu.pipeline_mode<synchronous>, transform_indices = @transform_3, window_bounds = array<i64: 128, 64>}, {pipeline_mode = #tpu.pipeline_mode<synchronous>, transform_indices = @transform_4, window_bounds = array<i64: 1, 64>}, {pipeline_mode = #tpu.pipeline_mode<synchronous>, transform_indices = @transform_5, window_bounds = array<i64: 64, 32>}, {pipeline_mode = #tpu.pipeline_mode<synchronous>, transform_indices = @transform_6, window_bounds = array<i64: 1, 32>}, {pipeline_mode = #tpu.pipeline_mode<synchronous>, transform_indices = @transform_7, window_bounds = array<i64: 32, 16>}, {pipeline_mode = #tpu.pipeline_mode<synchronous>, transform_indices = @transform_8, window_bounds = array<i64: 1, 16>}, {pipeline_mode = #tpu.pipeline_mode<synchronous>, transform_indices = @transform_9, window_bounds = array<i64: 16, 32>}, {pipeline_mode = #tpu.pipeline_mode<synchronous>, transform_indices = @transform_10, window_bounds = array<i64: 1, 32>}, {pipeline_mode = #tpu.pipeline_mode<synchronous>, transform_indices = @transform_11, window_bounds = array<i64: 32, 64>}, {pipeline_mode = #tpu.pipeline_mode<synchronous>, transform_indices = @transform_12, window_bounds = array<i64: 1, 64>}, {pipeline_mode = #tpu.pipeline_mode<synchronous>, transform_indices = @transform_13, window_bounds = array<i64: 64, 128>}, {pipeline_mode = #tpu.pipeline_mode<synchronous>, transform_indices = @transform_14, window_bounds = array<i64: 1, 128>}, {pipeline_mode = #tpu.pipeline_mode<synchronous>, transform_indices = @transform_15, window_bounds = array<i64: 128, 256>}, {pipeline_mode = #tpu.pipeline_mode<synchronous>, transform_indices = @transform_16, window_bounds = array<i64: 1, 256>}, {pipeline_mode = #tpu.pipeline_mode<synchronous>, transform_indices = @transform_17, window_bounds = array<i64: 1, 32>}, {pipeline_mode = #tpu.pipeline_mode<synchronous>, transform_indices = @transform_18, window_bounds = array<i64: 1, 32>}, {pipeline_mode = #tpu.pipeline_mode<synchronous>, transform_indices = @transform_19, window_bounds = array<i64: 1, 64>}, {pipeline_mode = #tpu.pipeline_mode<synchronous>, transform_indices = @transform_20, window_bounds = array<i64: 1, 64>}, {transform_indices = @transform_21, window_bounds = array<i64: 8, 256>}]} {
    %c0 = arith.constant 0 : index
    %c0_0 = arith.constant 0 : index
    %0 = vector.load %arg1[%c0, %c0_0] : memref<8x256xf32, #tpu.memory_space<vmem>>, vector<8x256xf32>
    %c0_1 = arith.constant 0 : index
    %c0_2 = arith.constant 0 : index
    %1 = vector.load %arg2[%c0_1, %c0_2] : memref<256x128xf32, #tpu.memory_space<vmem>>, vector<256x128xf32>
    %cst = arith.constant dense<0.000000e+00> : vector<8x128xf32>
    %2 = tpu.matmul %0, %1, %cst {dimension_numbers = #tpu.dot_dimension_numbers<[1], [0], [0], [1], [0, 0, 1, 1], [], []>} : vector<8x256xf32>, vector<256x128xf32>, vector<8x128xf32> -> vector<8x128xf32>
    %c0_3 = arith.constant 0 : index
    %c0_4 = arith.constant 0 : index
    %3 = vector.load %arg3[%c0_3, %c0_4] : memref<1x128xf32, #tpu.memory_space<vmem>>, vector<1x128xf32>
    %4 = vector.broadcast %3 : vector<1x128xf32> to vector<8x128xf32>
    %5 = arith.addf %2, %4 : vector<8x128xf32>
    %cst_5 = arith.constant 0.000000e+00 : f32
    %6 = vector.broadcast %cst_5 : f32 to vector<8x128xf32>
    %7 = arith.maximumf %5, %6 : vector<8x128xf32>
    %c0_6 = arith.constant 0 : index
    %c0_7 = arith.constant 0 : index
    %8 = vector.load %arg4[%c0_6, %c0_7] : memref<128x64xf32, #tpu.memory_space<vmem>>, vector<128x64xf32>
    %cst_8 = arith.constant dense<0.000000e+00> : vector<8x64xf32>
    %9 = tpu.matmul %7, %8, %cst_8 {dimension_numbers = #tpu.dot_dimension_numbers<[1], [0], [0], [1], [0, 0, 1, 1], [], []>} : vector<8x128xf32>, vector<128x64xf32>, vector<8x64xf32> -> vector<8x64xf32>
    %c0_9 = arith.constant 0 : index
    %c0_10 = arith.constant 0 : index
    %10 = vector.load %arg5[%c0_9, %c0_10] : memref<1x64xf32, #tpu.memory_space<vmem>>, vector<1x64xf32>
    %11 = vector.broadcast %10 : vector<1x64xf32> to vector<8x64xf32>
    %12 = arith.addf %9, %11 : vector<8x64xf32>
    %cst_11 = arith.constant 0.000000e+00 : f32
    %13 = vector.broadcast %cst_11 : f32 to vector<8x64xf32>
    %14 = arith.maximumf %12, %13 : vector<8x64xf32>
    %c0_12 = arith.constant 0 : index
    %c0_13 = arith.constant 0 : index
    %15 = vector.load %arg6[%c0_12, %c0_13] : memref<64x32xf32, #tpu.memory_space<vmem>>, vector<64x32xf32>
    %cst_14 = arith.constant dense<0.000000e+00> : vector<8x32xf32>
    %16 = tpu.matmul %14, %15, %cst_14 {dimension_numbers = #tpu.dot_dimension_numbers<[1], [0], [0], [1], [0, 0, 1, 1], [], []>} : vector<8x64xf32>, vector<64x32xf32>, vector<8x32xf32> -> vector<8x32xf32>
    %c0_15 = arith.constant 0 : index
    %c0_16 = arith.constant 0 : index
    %17 = vector.load %arg7[%c0_15, %c0_16] : memref<1x32xf32, #tpu.memory_space<vmem>>, vector<1x32xf32>
    %18 = vector.broadcast %17 : vector<1x32xf32> to vector<8x32xf32>
    %19 = arith.addf %16, %18 : vector<8x32xf32>
    %cst_17 = arith.constant 0.000000e+00 : f32
    %20 = vector.broadcast %cst_17 : f32 to vector<8x32xf32>
    %21 = arith.maximumf %19, %20 : vector<8x32xf32>
    %c0_18 = arith.constant 0 : index
    %c0_19 = arith.constant 0 : index
    %22 = vector.load %arg8[%c0_18, %c0_19] : memref<32x16xf32, #tpu.memory_space<vmem>>, vector<32x16xf32>
    %cst_20 = arith.constant dense<0.000000e+00> : vector<8x16xf32>
    %23 = tpu.matmul %21, %22, %cst_20 {dimension_numbers = #tpu.dot_dimension_numbers<[1], [0], [0], [1], [0, 0, 1, 1], [], []>} : vector<8x32xf32>, vector<32x16xf32>, vector<8x16xf32> -> vector<8x16xf32>
    %c0_21 = arith.constant 0 : index
    %c0_22 = arith.constant 0 : index
    %24 = vector.load %arg9[%c0_21, %c0_22] : memref<1x16xf32, #tpu.memory_space<vmem>>, vector<1x16xf32>
    %25 = vector.broadcast %24 : vector<1x16xf32> to vector<8x16xf32>
    %26 = arith.addf %23, %25 : vector<8x16xf32>
    %c0_23 = arith.constant 0 : index
    %c0_24 = arith.constant 0 : index
    %27 = vector.load %arg10[%c0_23, %c0_24] : memref<16x32xf32, #tpu.memory_space<vmem>>, vector<16x32xf32>
    %cst_25 = arith.constant dense<0.000000e+00> : vector<8x32xf32>
    %28 = tpu.matmul %26, %27, %cst_25 {dimension_numbers = #tpu.dot_dimension_numbers<[1], [0], [0], [1], [0, 0, 1, 1], [], []>} : vector<8x16xf32>, vector<16x32xf32>, vector<8x32xf32> -> vector<8x32xf32>
    %c0_26 = arith.constant 0 : index
    %c0_27 = arith.constant 0 : index
    %29 = vector.load %arg11[%c0_26, %c0_27] : memref<1x32xf32, #tpu.memory_space<vmem>>, vector<1x32xf32>
    %30 = vector.broadcast %29 : vector<1x32xf32> to vector<8x32xf32>
    %31 = arith.addf %28, %30 : vector<8x32xf32>
    %cst_28 = arith.constant 0.000000e+00 : f32
    %32 = vector.broadcast %cst_28 : f32 to vector<8x32xf32>
    %33 = arith.maximumf %31, %32 : vector<8x32xf32>
    %34 = arith.addf %33, %21 : vector<8x32xf32>
    %cst_29 = arith.constant dense<0.000000e+00> : vector<8xf32>
    %35 = vector.multi_reduction <add>, %34, %cst_29 [1] : vector<8x32xf32> to vector<8xf32>
    %36 = vector.shape_cast %35 : vector<8xf32> to vector<8x1xf32>
    %cst_30 = arith.constant 3.200000e+01 : f32
    %37 = vector.broadcast %cst_30 : f32 to vector<8x1xf32>
    %38 = arith.divf %36, %37 : vector<8x1xf32>
    %39 = vector.broadcast %38 : vector<8x1xf32> to vector<8x32xf32>
    %40 = arith.subf %34, %39 : vector<8x32xf32>
    %41 = arith.mulf %40, %40 : vector<8x32xf32>
    %cst_31 = arith.constant dense<0.000000e+00> : vector<8xf32>
    %42 = vector.multi_reduction <add>, %41, %cst_31 [1] : vector<8x32xf32> to vector<8xf32>
    %43 = vector.shape_cast %42 : vector<8xf32> to vector<8x1xf32>
    %cst_32 = arith.constant 3.200000e+01 : f32
    %44 = vector.broadcast %cst_32 : f32 to vector<8x1xf32>
    %45 = arith.divf %43, %44 : vector<8x1xf32>
    %46 = vector.broadcast %38 : vector<8x1xf32> to vector<8x32xf32>
    %47 = arith.subf %34, %46 : vector<8x32xf32>
    %cst_33 = arith.constant 9.99999974E-6 : f32
    %48 = vector.broadcast %cst_33 : f32 to vector<8x1xf32>
    %49 = arith.addf %45, %48 : vector<8x1xf32>
    %50 = math.rsqrt %49 : vector<8x1xf32>
    %51 = vector.broadcast %50 : vector<8x1xf32> to vector<8x32xf32>
    %52 = arith.mulf %47, %51 : vector<8x32xf32>
    %c0_34 = arith.constant 0 : index
    %c0_35 = arith.constant 0 : index
    %53 = vector.load %arg18[%c0_34, %c0_35] : memref<1x32xf32, #tpu.memory_space<vmem>>, vector<1x32xf32>
    %54 = vector.broadcast %53 : vector<1x32xf32> to vector<8x32xf32>
    %55 = arith.mulf %52, %54 : vector<8x32xf32>
    %c0_36 = arith.constant 0 : index
    %c0_37 = arith.constant 0 : index
    %56 = vector.load %arg19[%c0_36, %c0_37] : memref<1x32xf32, #tpu.memory_space<vmem>>, vector<1x32xf32>
    %57 = vector.broadcast %56 : vector<1x32xf32> to vector<8x32xf32>
    %58 = arith.addf %55, %57 : vector<8x32xf32>
    %c0_38 = arith.constant 0 : index
    %c0_39 = arith.constant 0 : index
    %59 = vector.load %arg12[%c0_38, %c0_39] : memref<32x64xf32, #tpu.memory_space<vmem>>, vector<32x64xf32>
    %cst_40 = arith.constant dense<0.000000e+00> : vector<8x64xf32>
    %60 = tpu.matmul %58, %59, %cst_40 {dimension_numbers = #tpu.dot_dimension_numbers<[1], [0], [0], [1], [0, 0, 1, 1], [], []>} : vector<8x32xf32>, vector<32x64xf32>, vector<8x64xf32> -> vector<8x64xf32>
    %c0_41 = arith.constant 0 : index
    %c0_42 = arith.constant 0 : index
    %61 = vector.load %arg13[%c0_41, %c0_42] : memref<1x64xf32, #tpu.memory_space<vmem>>, vector<1x64xf32>
    %62 = vector.broadcast %61 : vector<1x64xf32> to vector<8x64xf32>
    %63 = arith.addf %60, %62 : vector<8x64xf32>
    %cst_43 = arith.constant 0.000000e+00 : f32
    %64 = vector.broadcast %cst_43 : f32 to vector<8x64xf32>
    %65 = arith.maximumf %63, %64 : vector<8x64xf32>
    %66 = arith.addf %65, %14 : vector<8x64xf32>
    %cst_44 = arith.constant dense<0.000000e+00> : vector<8xf32>
    %67 = vector.multi_reduction <add>, %66, %cst_44 [1] : vector<8x64xf32> to vector<8xf32>
    %68 = vector.shape_cast %67 : vector<8xf32> to vector<8x1xf32>
    %cst_45 = arith.constant 6.400000e+01 : f32
    %69 = vector.broadcast %cst_45 : f32 to vector<8x1xf32>
    %70 = arith.divf %68, %69 : vector<8x1xf32>
    %71 = vector.broadcast %70 : vector<8x1xf32> to vector<8x64xf32>
    %72 = arith.subf %66, %71 : vector<8x64xf32>
    %73 = arith.mulf %72, %72 : vector<8x64xf32>
    %cst_46 = arith.constant dense<0.000000e+00> : vector<8xf32>
    %74 = vector.multi_reduction <add>, %73, %cst_46 [1] : vector<8x64xf32> to vector<8xf32>
    %75 = vector.shape_cast %74 : vector<8xf32> to vector<8x1xf32>
    %cst_47 = arith.constant 6.400000e+01 : f32
    %76 = vector.broadcast %cst_47 : f32 to vector<8x1xf32>
    %77 = arith.divf %75, %76 : vector<8x1xf32>
    %78 = vector.broadcast %70 : vector<8x1xf32> to vector<8x64xf32>
    %79 = arith.subf %66, %78 : vector<8x64xf32>
    %cst_48 = arith.constant 9.99999974E-6 : f32
    %80 = vector.broadcast %cst_48 : f32 to vector<8x1xf32>
    %81 = arith.addf %77, %80 : vector<8x1xf32>
    %82 = math.rsqrt %81 : vector<8x1xf32>
    %83 = vector.broadcast %82 : vector<8x1xf32> to vector<8x64xf32>
    %84 = arith.mulf %79, %83 : vector<8x64xf32>
    %c0_49 = arith.constant 0 : index
    %c0_50 = arith.constant 0 : index
    %85 = vector.load %arg20[%c0_49, %c0_50] : memref<1x64xf32, #tpu.memory_space<vmem>>, vector<1x64xf32>
    %86 = vector.broadcast %85 : vector<1x64xf32> to vector<8x64xf32>
    %87 = arith.mulf %84, %86 : vector<8x64xf32>
    %c0_51 = arith.constant 0 : index
    %c0_52 = arith.constant 0 : index
    %88 = vector.load %arg21[%c0_51, %c0_52] : memref<1x64xf32, #tpu.memory_space<vmem>>, vector<1x64xf32>
    %89 = vector.broadcast %88 : vector<1x64xf32> to vector<8x64xf32>
    %90 = arith.addf %87, %89 : vector<8x64xf32>
    %c0_53 = arith.constant 0 : index
    %c0_54 = arith.constant 0 : index
    %91 = vector.load %arg14[%c0_53, %c0_54] : memref<64x128xf32, #tpu.memory_space<vmem>>, vector<64x128xf32>
    %cst_55 = arith.constant dense<0.000000e+00> : vector<8x128xf32>
    %92 = tpu.matmul %90, %91, %cst_55 {dimension_numbers = #tpu.dot_dimension_numbers<[1], [0], [0], [1], [0, 0, 1, 1], [], []>} : vector<8x64xf32>, vector<64x128xf32>, vector<8x128xf32> -> vector<8x128xf32>
    %c0_56 = arith.constant 0 : index
    %c0_57 = arith.constant 0 : index
    %93 = vector.load %arg15[%c0_56, %c0_57] : memref<1x128xf32, #tpu.memory_space<vmem>>, vector<1x128xf32>
    %94 = vector.broadcast %93 : vector<1x128xf32> to vector<8x128xf32>
    %95 = arith.addf %92, %94 : vector<8x128xf32>
    %cst_58 = arith.constant 0.000000e+00 : f32
    %96 = vector.broadcast %cst_58 : f32 to vector<8x128xf32>
    %97 = arith.maximumf %95, %96 : vector<8x128xf32>
    %98 = arith.addf %97, %7 : vector<8x128xf32>
    %c0_59 = arith.constant 0 : index
    %c0_60 = arith.constant 0 : index
    %99 = vector.load %arg16[%c0_59, %c0_60] : memref<128x256xf32, #tpu.memory_space<vmem>>, vector<128x256xf32>
    %cst_61 = arith.constant dense<0.000000e+00> : vector<8x256xf32>
    %100 = tpu.matmul %98, %99, %cst_61 {dimension_numbers = #tpu.dot_dimension_numbers<[1], [0], [0], [1], [0, 0, 1, 1], [], []>} : vector<8x128xf32>, vector<128x256xf32>, vector<8x256xf32> -> vector<8x256xf32>
    %c0_62 = arith.constant 0 : index
    %c0_63 = arith.constant 0 : index
    %101 = vector.load %arg17[%c0_62, %c0_63] : memref<1x256xf32, #tpu.memory_space<vmem>>, vector<1x256xf32>
    %102 = vector.broadcast %101 : vector<1x256xf32> to vector<8x256xf32>
    %103 = arith.addf %100, %102 : vector<8x256xf32>
    %c0_64 = arith.constant 0 : index
    %c0_65 = arith.constant 0 : index
    %104 = vector.load %arg22[%c0_64, %c0_65] : memref<8x256xf32, #tpu.memory_space<vmem>>, vector<8x256xf32>
    tpu.vector_store %arg22[%c0_64, %c0_65], %103 {strides = array<i32>} : memref<8x256xf32, #tpu.memory_space<vmem>>, vector<8x256xf32>,
    return
  }
  func.func @transform_0(%arg0: i32) -> (i32, i32) {
    %c0_i32 = arith.constant 0 : i32
    %c0_i32_0 = arith.constant 0 : i32
    return %arg0, %c0_i32 : i32, i32
  }
  func.func @transform_1(%arg0: i32) -> (i32, i32) {
    %c0_i32 = arith.constant 0 : i32
    %c0_i32_0 = arith.constant 0 : i32
    %c0_i32_1 = arith.constant 0 : i32
    return %c0_i32, %c0_i32_0 : i32, i32
  }
  func.func @transform_2(%arg0: i32) -> (i32, i32) {
    %c0_i32 = arith.constant 0 : i32
    %c0_i32_0 = arith.constant 0 : i32
    %c0_i32_1 = arith.constant 0 : i32
    return %c0_i32, %c0_i32_0 : i32, i32
  }
  func.func @transform_3(%arg0: i32) -> (i32, i32) {
    %c0_i32 = arith.constant 0 : i32
    %c0_i32_0 = arith.constant 0 : i32
    %c0_i32_1 = arith.constant 0 : i32
    return %c0_i32, %c0_i32_0 : i32, i32
  }
  func.func @transform_4(%arg0: i32) -> (i32, i32) {
    %c0_i32 = arith.constant 0 : i32
    %c0_i32_0 = arith.constant 0 : i32
    %c0_i32_1 = arith.constant 0 : i32
    return %c0_i32, %c0_i32_0 : i32, i32
  }
  func.func @transform_5(%arg0: i32) -> (i32, i32) {
    %c0_i32 = arith.constant 0 : i32
    %c0_i32_0 = arith.constant 0 : i32
    %c0_i32_1 = arith.constant 0 : i32
    return %c0_i32, %c0_i32_0 : i32, i32
  }
  func.func @transform_6(%arg0: i32) -> (i32, i32) {
    %c0_i32 = arith.constant 0 : i32
    %c0_i32_0 = arith.constant 0 : i32
    %c0_i32_1 = arith.constant 0 : i32
    return %c0_i32, %c0_i32_0 : i32, i32
  }
  func.func @transform_7(%arg0: i32) -> (i32, i32) {
    %c0_i32 = arith.constant 0 : i32
    %c0_i32_0 = arith.constant 0 : i32
    %c0_i32_1 = arith.constant 0 : i32
    return %c0_i32, %c0_i32_0 : i32, i32
  }
  func.func @transform_8(%arg0: i32) -> (i32, i32) {
    %c0_i32 = arith.constant 0 : i32
    %c0_i32_0 = arith.constant 0 : i32
    %c0_i32_1 = arith.constant 0 : i32
    return %c0_i32, %c0_i32_0 : i32, i32
  }
  func.func @transform_9(%arg0: i32) -> (i32, i32) {
    %c0_i32 = arith.constant 0 : i32
    %c0_i32_0 = arith.constant 0 : i32
    %c0_i32_1 = arith.constant 0 : i32
    return %c0_i32, %c0_i32_0 : i32, i32
  }
  func.func @transform_10(%arg0: i32) -> (i32, i32) {
    %c0_i32 = arith.constant 0 : i32
    %c0_i32_0 = arith.constant 0 : i32
    %c0_i32_1 = arith.constant 0 : i32
    return %c0_i32, %c0_i32_0 : i32, i32
  }
  func.func @transform_11(%arg0: i32) -> (i32, i32) {
    %c0_i32 = arith.constant 0 : i32
    %c0_i32_0 = arith.constant 0 : i32
    %c0_i32_1 = arith.constant 0 : i32
    return %c0_i32, %c0_i32_0 : i32, i32
  }
  func.func @transform_12(%arg0: i32) -> (i32, i32) {
    %c0_i32 = arith.constant 0 : i32
    %c0_i32_0 = arith.constant 0 : i32
    %c0_i32_1 = arith.constant 0 : i32
    return %c0_i32, %c0_i32_0 : i32, i32
  }
  func.func @transform_13(%arg0: i32) -> (i32, i32) {
    %c0_i32 = arith.constant 0 : i32
    %c0_i32_0 = arith.constant 0 : i32
    %c0_i32_1 = arith.constant 0 : i32
    return %c0_i32, %c0_i32_0 : i32, i32
  }
  func.func @transform_14(%arg0: i32) -> (i32, i32) {
    %c0_i32 = arith.constant 0 : i32
    %c0_i32_0 = arith.constant 0 : i32
    %c0_i32_1 = arith.constant 0 : i32
    return %c0_i32, %c0_i32_0 : i32, i32
  }
  func.func @transform_15(%arg0: i32) -> (i32, i32) {
    %c0_i32 = arith.constant 0 : i32
    %c0_i32_0 = arith.constant 0 : i32
    %c0_i32_1 = arith.constant 0 : i32
    return %c0_i32, %c0_i32_0 : i32, i32
  }
  func.func @transform_16(%arg0: i32) -> (i32, i32) {
    %c0_i32 = arith.constant 0 : i32
    %c0_i32_0 = arith.constant 0 : i32
    %c0_i32_1 = arith.constant 0 : i32
    return %c0_i32, %c0_i32_0 : i32, i32
  }
  func.func @transform_17(%arg0: i32) -> (i32, i32) {
    %c0_i32 = arith.constant 0 : i32
    %c0_i32_0 = arith.constant 0 : i32
    %c0_i32_1 = arith.constant 0 : i32
    return %c0_i32, %c0_i32_0 : i32, i32
  }
  func.func @transform_18(%arg0: i32) -> (i32, i32) {
    %c0_i32 = arith.constant 0 : i32
    %c0_i32_0 = arith.constant 0 : i32
    %c0_i32_1 = arith.constant 0 : i32
    return %c0_i32, %c0_i32_0 : i32, i32
  }
  func.func @transform_19(%arg0: i32) -> (i32, i32) {
    %c0_i32 = arith.constant 0 : i32
    %c0_i32_0 = arith.constant 0 : i32
    %c0_i32_1 = arith.constant 0 : i32
    return %c0_i32, %c0_i32_0 : i32, i32
  }
  func.func @transform_20(%arg0: i32) -> (i32, i32) {
    %c0_i32 = arith.constant 0 : i32
    %c0_i32_0 = arith.constant 0 : i32
    %c0_i32_1 = arith.constant 0 : i32
    return %c0_i32, %c0_i32_0 : i32, i32
  }
  func.func @transform_21(%arg0: i32) -> (i32, i32) {
    %c0_i32 = arith.constant 0 : i32
    %c0_i32_0 = arith.constant 0 : i32
    return %arg0, %c0_i32 : i32, i32
  }
}

</mosaic_0001>

<bundles_post_ra>
// kernel: tpu_custom_call.1
= control target key start
LH: loop header
LB: loop body
LE: loop exit
PB: predicated region body
PF: predicated region fallthrough
CT: control target
= control target key end

     0   :  { %s2075_s0 = inlined_call_operand.hbm [shape: f32[8,256], index: 0, kind: input, shape index: {}]   ;;  %s2076_s1 = inlined_call_operand.vmem [shape: f32[256,128], index: 1, kind: input, shape index: {}]   ;;  %s2077_s2 = inlined_call_operand.hbm [shape: f32[1,128], index: 2, kind: input, shape index: {}]   ;;  %s2078_s3 = inlined_call_operand.vmem [shape: f32[128,64], index: 3, kind: input, shape index: {}]   ;;  %s2079_s4 = inlined_call_operand.hbm [shape: f32[1,64], index: 4, kind: input, shape index: {}]   ;;  %s2080_s5 = inlined_call_operand.vmem [shape: f32[64,32], index: 5, kind: input, shape index: {}]   ;;  %s2081_s6 = inlined_call_operand.hbm [shape: f32[1,32], index: 6, kind: input, shape index: {}]   ;;  %s2082_s7 = inlined_call_operand.vmem [shape: f32[32,16], index: 7, kind: input, shape index: {}]   ;;  %s2083_s8 = inlined_call_operand.hbm [shape: f32[1,16], index: 8, kind: input, shape index: {}]   ;;  %s2084_s9 = inlined_call_operand.vmem [shape: f32[16,32], index: 9, kind: input, shape index: {}]   ;;  %s2085_s10 = inlined_call_operand.vmem [shape: f32[1,32], index: 10, kind: input, shape index: {}]   ;;  %s2086_s11 = inlined_call_operand.hbm [shape: f32[32,64], index: 11, kind: input, shape index: {}]   ;;  %s2087_s12 = inlined_call_operand.vmem [shape: f32[1,64], index: 12, kind: input, shape index: {}]   ;;  %s2088_s13 = inlined_call_operand.hbm [shape: f32[64,128], index: 13, kind: input, shape index: {}]   ;;  %s2089_s14 = inlined_call_operand.vmem [shape: f32[1,128], index: 14, kind: input, shape index: {}]   ;;  %s2090_s15 = inlined_call_operand.hbm [shape: f32[128,256], index: 15, kind: input, shape index: {}]   ;;  %s2091_s16 = inlined_call_operand.vmem [shape: f32[1,256], index: 16, kind: input, shape index: {}]   ;;  %s2092_s17 = inlined_call_operand.vmem [shape: f32[1,32], index: 17, kind: input, shape index: {}]   ;;  %s2093_s18 = inlined_call_operand.vmem [shape: f32[1,32], index: 18, kind: input, shape index: {}]   ;;  %s2094_s19 = inlined_call_operand.vmem [shape: f32[1,64], index: 19, kind: input, shape index: {}]   ;;  %s2095_s20 = inlined_call_operand.vmem [shape: f32[1,64], index: 20, kind: input, shape index: {}]   ;;  %s2096_s21 = inlined_call_operand.hbm [shape: f32[8,256], index: 21, kind: output, shape index: {}]  }
   0x1   :  { %2104 = sst [smem:[#allocation23_spill]] %s2075_s0 }
   0x2   :  { %2105 = sst [smem:[#allocation24_spill]] %s2076_s1 }
   0x3   :  { %2106 = sst [smem:[#allocation25_spill]] %s2077_s2 }
   0x4   :  { %2107 = sst [smem:[#allocation26_spill]] %s2078_s3 }
   0x5   :  { %2108 = sst [smem:[#allocation27_spill]] %s2079_s4 }
   0x6   :  { %2109 = sst [smem:[#allocation28_spill]] %s2080_s5 }
   0x7   :  { %2110 = sst [smem:[#allocation29_spill]] %s2096_s21 }
   0x8   :  { %26 = vsyncpa [#allocation3], 0 }
   0x9   :  { %27 = vsyncpa [#allocation6], 0 }
   0xa   :  { %28 = vsyncpa [#allocation9], 0 }
   0xb   :  { %29 = vsyncpa [#allocation12], 0 }
   0xc   :  { %30 = vsyncpa [#allocation15], 0 }
   0xd   :  { %31 = vsyncpa [#allocation4], 0  ;;  %s1564_s2 = smov [#allocation5]   ;;  %s1565_s26 = smov [#allocation8]  }
   0xe   :  { %s50_s25 = sshll.u32 %s1564_s2, 4  ;;  %s74_s27 = sshll.u32 %s1565_s26, 4  ;;  %s51_s25 = int_to_ptr.vmem [resolvable:$true] %s50_s25  ;;  %s75_s27 = int_to_ptr.vmem [resolvable:$true] %s74_s27 }
   0xf   :  { %s2111_s29 = sld [smem:[#allocation25_spill]] }
  0x15   :  { %s1354_s0 = scalar_lea.hbm %s2111_s29, 16 }
  0x16   :  { %p1355_p0 = scmp.ne.s32.totalorder %s2111_s29, %s1354_s0  ;;  %p1358_p1 = scmp.lt.u32.totalorder %s1354_s0, %s2111_s29 }
  0x18   :  { %p1360_p2 = pnand %p1358_p1, %p1355_p0 }
  0x1a   :  { %1363 = shalt.err (!%p1360_p2)
}
  0x1b   :  { %s1364_s23 = scalar_lea.vmem %s51_s25, 16  ;;  %s1368_s1 = scalar_lea.vmem %s51_s25, 32 }
  0x1c   :  { %p1365_p3 = scmp.ne.s32.totalorder %s51_s25, %s1364_s23  ;;  %p1369_p4 = scmp.lt.s32.totalorder %s51_s25, %s51_s25 }
  0x1d   :  { %p1370_p5 = scmp.lt.s32.totalorder %s1368_s1, %s1364_s23 }
  0x1f   :  { %p1371_p6 = por %p1370_p5, %p1369_p4 }
  0x21   :  { %p1372_p7 = pnand %p1371_p6, %p1365_p3 }
  0x23   :  { %1375 = shalt.err (!%p1372_p7)
}
  0x24   :  { %53 = dma.hbm_to_vmem [thread:$0]  %s2111_s29, 16, %s51_s25, [#allocation6]  }
  0x25   :  { %s1376_s28 = scalar_lea.hbm %s2081_s6, 16 }
  0x26   :  { %p1377_p8 = scmp.ne.s32.totalorder %s2081_s6, %s1376_s28  ;;  %p1380_p9 = scmp.lt.u32.totalorder %s1376_s28, %s2081_s6 }
  0x28   :  { %p1382_p10 = pnand %p1380_p9, %p1377_p8 }
  0x2a   :  { %1385 = shalt.err (!%p1382_p10)
}
  0x2b   :  { %s1386_s22 = scalar_lea.vmem %s75_s27, 16  ;;  %s1390_s23 = scalar_lea.vmem %s75_s27, 32 }
  0x2c   :  { %p1387_p11 = scmp.ne.s32.totalorder %s75_s27, %s1386_s22  ;;  %p1391_p12 = scmp.lt.s32.totalorder %s75_s27, %s75_s27 }
  0x2d   :  { %p1392_p13 = scmp.lt.s32.totalorder %s1390_s23, %s1386_s22 }
  0x2f   :  { %p1393_p0 = por %p1392_p13, %p1391_p12 }
  0x31   :  { %p1394_p1 = pnand %p1393_p0, %p1387_p11 }
  0x33   :  { %1397 = shalt.err (!%p1394_p1)
}
  0x34   :  { %77 = dma.hbm_to_vmem [thread:$0]  %s2081_s6, 16, %s75_s27, [#allocation9]  }
  0x35   :  { %s1566_s1 = smov [#allocation11]   ;;  %s1398_s3 = scalar_lea.hbm %s2086_s11, 512 }
  0x36   :  { %s99_s24 = sshll.u32 %s1566_s1, 4  ;;  %p1399_p2 = scmp.ne.s32.totalorder %s2086_s11, %s1398_s3  ;;  %s100_s24 = int_to_ptr.vmem [resolvable:$true] %s99_s24 }
  0x37   :  { %p1402_p3 = scmp.lt.u32.totalorder %s1398_s3, %s2086_s11 }
  0x39   :  { %p1404_p4 = pnand %p1402_p3, %p1399_p2 }
  0x3b   :  { %1407 = shalt.err (!%p1404_p4)
}
  0x3c   :  { %s1408_s5 = scalar_lea.vmem %s100_s24, 512  ;;  %p1413_p6 = scmp.lt.s32.totalorder %s100_s24, %s100_s24 }
  0x3d   :  { %p1409_p5 = scmp.ne.s32.totalorder %s100_s24, %s1408_s5  ;;  %p1414_p7 = scmp.lt.s32.totalorder %s1408_s5, %s1408_s5 }
  0x3f   :  { %p1415_p8 = por %p1414_p7, %p1413_p6 }
  0x41   :  { %p1416_p9 = pnand %p1415_p8, %p1409_p5 }
  0x43   :  { %1419 = shalt.err (!%p1416_p9)
}
  0x44   :  { %s1567_s6 = smov 128   ;;  %s1568_s27 = smov 8  }
  0x45   :  { %105 = dma.hbm_to_vmem [thread:$0]  %s2086_s11, 512, %s100_s24, [#allocation12], %s1567_s6, %s1567_s6, %s1568_s27  }
  0x46   :  { %s1569_s25 = smov [#allocation2]   ;;  %s1570_s1 = smov [#allocation7]  }
  0x47   :  { %s38_s29 = sshll.u32 %s1569_s25, 4  ;;  %s62_s2 = sshll.u32 %s1570_s1, 4  ;;  %s39_s29 = int_to_ptr.vmem [resolvable:$true] %s38_s29  ;;  %s63_s2 = int_to_ptr.vmem [resolvable:$true] %s62_s2 }
  0x48   :  { %s2112_s28 = sld [smem:[#allocation23_spill]] }
  0x4e   :  { %s1420_s4 = scalar_lea.hbm %s2112_s28, 256 }
  0x4f   :  { %p1421_p10 = scmp.ne.s32.totalorder %s2112_s28, %s1420_s4  ;;  %p1424_p11 = scmp.lt.u32.totalorder %s1420_s4, %s2112_s28 }
  0x51   :  { %p1426_p12 = pnand %p1424_p11, %p1421_p10 }
  0x53   :  { %1429 = shalt.err (!%p1426_p12)
}
  0x54   :  { %s1430_s11 = scalar_lea.vmem %s39_s29, 256  ;;  %p1435_p0 = scmp.lt.s32.totalorder %s39_s29, %s39_s29 }
  0x55   :  { %p1431_p13 = scmp.ne.s32.totalorder %s39_s29, %s1430_s11  ;;  %p1436_p1 = scmp.lt.s32.totalorder %s1430_s11, %s1430_s11 }
  0x57   :  { %p1437_p2 = por %p1436_p1, %p1435_p0 }
  0x59   :  { %p1438_p3 = pnand %p1437_p2, %p1431_p13 }
  0x5b   :  { %1441 = shalt.err (!%p1438_p3)
}
  0x5c   :  { %41 = dma.hbm_to_vmem [thread:$0]  %s2112_s28, 256, %s39_s29, [#allocation3]  }
  0x5d   :  { %s2113_s1 = sld [smem:[#allocation27_spill]] }
  0x63   :  { %s1442_s26 = scalar_lea.hbm %s2113_s1, 16 }
  0x64   :  { %p1443_p4 = scmp.ne.s32.totalorder %s2113_s1, %s1442_s26  ;;  %p1446_p5 = scmp.lt.u32.totalorder %s1442_s26, %s2113_s1 }
  0x66   :  { %p1448_p6 = pnand %p1446_p5, %p1443_p4 }
  0x68   :  { %1451 = shalt.err (!%p1448_p6)
}
  0x69   :  { %s1452_s30 = scalar_lea.vmem %s63_s2, 16  ;;  %s1456_s5 = scalar_lea.vmem %s63_s2, 32 }
  0x6a   :  { %p1453_p7 = scmp.ne.s32.totalorder %s63_s2, %s1452_s30  ;;  %p1457_p8 = scmp.lt.s32.totalorder %s63_s2, %s63_s2 }
  0x6b   :  { %p1458_p9 = scmp.lt.s32.totalorder %s1456_s5, %s1452_s30 }
  0x6d   :  { %p1459_p10 = por %p1458_p9, %p1457_p8 }
  0x6f   :  { %p1460_p11 = pnand %p1459_p10, %p1453_p7 }
  0x71   :  { %1463 = shalt.err (!%p1460_p11)
}
  0x72   :  { %65 = dma.hbm_to_vmem [thread:$0]  %s2113_s1, 16, %s63_s2, [#allocation6]  }
  0x73   :  { %s1571_s11 = smov [#allocation10]   ;;  %s1572_s22 = smov [#allocation13]  }
  0x74   :  { %s86_s24 = sshll.u32 %s1571_s11, 4  ;;  %s113_s23 = sshll.u32 %s1572_s22, 4  ;;  %s87_s24 = int_to_ptr.vmem [resolvable:$true] %s86_s24  ;;  %s114_s23 = int_to_ptr.vmem [resolvable:$true] %s113_s23 }
  0x75   :  { %s1464_s21 = scalar_lea.hbm %s2083_s8, 16 }
  0x76   :  { %p1465_p12 = scmp.ne.s32.totalorder %s2083_s8, %s1464_s21  ;;  %p1468_p13 = scmp.lt.u32.totalorder %s1464_s21, %s2083_s8 }
  0x78   :  { %p1470_p0 = pnand %p1468_p13, %p1465_p12 }
  0x7a   :  { %1473 = shalt.err (!%p1470_p0)
}
  0x7b   :  { %s1474_s2 = scalar_lea.vmem %s87_s24, 16  ;;  %s1478_s1 = scalar_lea.vmem %s87_s24, 32 }
  0x7c   :  { %p1475_p1 = scmp.ne.s32.totalorder %s87_s24, %s1474_s2  ;;  %p1479_p2 = scmp.lt.s32.totalorder %s87_s24, %s87_s24 }
  0x7d   :  { %p1480_p3 = scmp.lt.s32.totalorder %s1478_s1, %s1474_s2 }
  0x7f   :  { %p1481_p4 = por %p1480_p3, %p1479_p2 }
  0x81   :  { %p1482_p5 = pnand %p1481_p4, %p1475_p1 }
  0x83   :  { %1485 = shalt.err (!%p1482_p5)
}
  0x84   :  { %89 = dma.hbm_to_vmem [thread:$0]  %s2083_s8, 16, %s87_s24, [#allocation9]  }
  0x85   :  { %s1486_s22 = scalar_lea.hbm %s2088_s13, 1024 }
  0x86   :  { %p1487_p6 = scmp.ne.s32.totalorder %s2088_s13, %s1486_s22  ;;  %p1490_p7 = scmp.lt.u32.totalorder %s1486_s22, %s2088_s13 }
  0x88   :  { %p1492_p8 = pnand %p1490_p7, %p1487_p6 }
  0x8a   :  { %1495 = shalt.err (!%p1492_p8)
}
  0x8b   :  { %s1496_s4 = scalar_lea.vmem %s114_s23, 1024  ;;  %p1501_p10 = scmp.lt.s32.totalorder %s114_s23, %s114_s23 }
  0x8c   :  { %p1497_p9 = scmp.ne.s32.totalorder %s114_s23, %s1496_s4  ;;  %p1502_p11 = scmp.lt.s32.totalorder %s1496_s4, %s1496_s4 }
  0x8e   :  { %p1503_p12 = por %p1502_p11, %p1501_p10 }
  0x90   :  { %p1504_p13 = pnand %p1503_p12, %p1497_p9 }
  0x92   :  { %1507 = shalt.err (!%p1504_p13)
}
  0x93   :  { %119 = dma.hbm_to_vmem [thread:$0]  %s2088_s13, 1024, %s114_s23, [#allocation12], %s1567_s6, %s1567_s6, %s1568_s27  }
  0x94   :  { %s1573_s0 = smov [#allocation14]   ;;  %s1508_s5 = scalar_lea.hbm %s2090_s15, 4096 }
  0x95   :  { %s127_s30 = sshll.u32 %s1573_s0, 4  ;;  %p1509_p0 = scmp.ne.s32.totalorder %s2090_s15, %s1508_s5  ;;  %s128_s30 = int_to_ptr.vmem [resolvable:$true] %s127_s30 }
  0x96   :  { %p1512_p1 = scmp.lt.u32.totalorder %s1508_s5, %s2090_s15 }
  0x98   :  { %p1514_p2 = pnand %p1512_p1, %p1509_p0 }
  0x9a   :  { %1517 = shalt.err (!%p1514_p2)
}
  0x9b   :  { %s1518_s25 = scalar_lea.vmem %s128_s30, 4096  ;;  %p1523_p4 = scmp.lt.s32.totalorder %s128_s30, %s128_s30 }
  0x9c   :  { %p1519_p3 = scmp.ne.s32.totalorder %s128_s30, %s1518_s25  ;;  %p1524_p5 = scmp.lt.s32.totalorder %s1518_s25, %s1518_s25 }
  0x9e   :  { %p1525_p6 = por %p1524_p5, %p1523_p4 }
  0xa0   :  { %p1526_p7 = pnand %p1525_p6, %p1519_p3 }
  0xa2   :  { %1529 = shalt.err (!%p1526_p7)
}
  0xa3   :  { %s1574_s13 = smov 256   ;;  %s1575_s6 = smov 16  }
  0xa4   :  { %133 = dma.hbm_to_vmem [thread:$0]  %s2090_s15, 4096, %s128_s30, [#allocation15], %s1574_s13, %s1574_s13, %s1575_s6  }
  0xa5   :  { %1552 = dma.done.wait [#allocation3], 256  }
  0xa6   :  { %1553 = vsyncadd [#allocation3], 4294967040 }
  0xa7   :  { %1554 = dma.done.wait [#allocation6], 32  }
  0xa8   :  { %1555 = vsyncadd [#allocation6], 4294967264 }
  0xa9   :  { %1556 = dma.done.wait [#allocation9], 32  }
  0xaa   :  { %1557 = vsyncadd [#allocation9], 4294967264 }
  0xab   :  { %1558 = dma.done.wait [#allocation12], 1536  }
  0xac   :  { %1559 = vsyncadd [#allocation12], 4294965760 }
  0xad   :  { %1560 = dma.done.wait [#allocation15], 4096  }
  0xae   :  { %1561 = vsyncadd [#allocation15], 4294963200  ;;  %v1576_v0 = vmov 0.0|0.0   ;;  %s2114_s3 = sld [smem:[#allocation24_spill]]  ;;  %v169_v26 = vld [vmem:[#allocation2 + $0x8] sm:$0xff]  ;;  %s2115_s27 = sld [smem:[#allocation26_spill]] }
  0xaf   :  { %1239 = vmatprep.subr.bf16.mxu1 %v1576_v0  ;;  %273 = vmatprep.mubr.f32.mxu0 %v169_v26  ;;  %vm1577_vm0 = vmmov 0   ;;  %s2116_s21 = sld [smem:[#allocation28_spill]]  ;;  %vm389_vm1 = vcmask 523264   ;;  %vm475_vm2 = vcmask 261120   ;;  %vm558_vm3 = vcmask 130048   ;;  %s1579_s11 = smov [#allocation16]  }
  0xb4   :  { %v186_v1 = vld [vmem:[%s2114_s3 + $0x80] sm:$0xff]  ;;  %v187_v2 = vld [vmem:[%s2114_s3 + $0x88] sm:$0xff]  ;;  %v188_v6 = vld [vmem:[%s2114_s3 + $0x90] sm:$0xff] }
  0xb5   :  { %v170_v3 = vld [vmem:[%s2114_s3] sm:$0xff]  ;;  %v1207_v4 = vpack.c.bf16 %v187_v2, %v186_v1  ;;  %v171_v5 = vld [vmem:[%s2114_s3 + $0x8] sm:$0xff]  ;;  %v189_v7 = vld [vmem:[%s2114_s3 + $0x98] sm:$0xff] }
  0xb6   :  { %v1209_v8 = vpack.c.bf16 %v171_v5, %v170_v3  ;;  %v1211_v9 = vpack.c.bf16 %v189_v7, %v188_v6  ;;  %v172_v10 = vld [vmem:[%s2114_s3 + $0x10] sm:$0xff]  ;;  %v173_v11 = vld [vmem:[%s2114_s3 + $0x18] sm:$0xff]  ;;  %v190_v12 = vld [vmem:[%s2114_s3 + $0xa0] sm:$0xff] }
  0xb7   :  { %1208 = vmatprep.subr.bf16.mxu0 %v1207_v4  ;;  %v191_v13 = vld [vmem:[%s2114_s3 + $0xa8] sm:$0xff]  ;;  %v1213_v14 = vpack.c.bf16 %v173_v11, %v172_v10  ;;  %v174_v16 = vld [vmem:[%s2114_s3 + $0x20] sm:$0xff]  ;;  %v192_v18 = vld [vmem:[%s2114_s3 + $0xb0] sm:$0xff] }
  0xb8   :  { %1210 = vmatpush3.bf16.msra.mxu0 %v1209_v8  ;;  %v1215_v15 = vpack.c.bf16 %v191_v13, %v190_v12  ;;  %v175_v17 = vld [vmem:[%s2114_s3 + $0x28] sm:$0xff]  ;;  %v193_v19 = vld [vmem:[%s2114_s3 + $0xb8] sm:$0xff]  ;;  %v176_v22 = vld [vmem:[%s2114_s3 + $0x30] sm:$0xff]  ;;  %v1578_v12 = vmov 0.0  }
  0xb9   :  { %1212 = vmatprep.subr.bf16.mxu0 %v1211_v9  ;;  %v1217_v20 = vpack.c.bf16 %v175_v17, %v174_v16  ;;  %v1219_v21 = vpack.c.bf16 %v193_v19, %v192_v18  ;;  %v177_v23 = vld [vmem:[%s2114_s3 + $0x38] sm:$0xff]  ;;  %v194_v24 = vld [vmem:[%s2114_s3 + $0xc0] sm:$0xff]  ;;  %v195_v25 = vld [vmem:[%s2114_s3 + $0xc8] sm:$0xff]  ;;  %1137 = vmatprep.mubr.msk.f32.mxu1 %vm1577_vm0, %v1578_v12 }
  0xba   :  { %v280_v27 = vld [vmem:[%s2115_s27] sm:$0xff]  ;;  %v281_v28 = vld [vmem:[%s2115_s27 + $0x8] sm:$0xff]  ;;  %v1221_v29 = vpack.c.bf16 %v177_v23, %v176_v22  ;;  %v282_v31 = vld [vmem:[%s2115_s27 + $0x10] sm:$0xff]  ;;  %v1223_v33 = vpack.c.bf16 %v195_v25, %v194_v24 }
  0xbb   :  { %v1240_v30 = vpack.c.bf16 %v281_v28, %v280_v27  ;;  %v283_v32 = vld [vmem:[%s2115_s27 + $0x18] sm:$0xff]  ;;  %v178_v34 = vld [vmem:[%s2114_s3 + $0x40] sm:$0xff]  ;;  %v179_v35 = vld [vmem:[%s2114_s3 + $0x48] sm:$0xff] }
  0xbc   :  { %1214 = vmatpush3.bf16.msra.mxu0 %v1213_v14  ;;  %v196_v36 = vld [vmem:[%s2114_s3 + $0xd0] sm:$0xff]  ;;  %v197_v37 = vld [vmem:[%s2114_s3 + $0xd8] sm:$0xff]  ;;  %v1243_v38 = vpack.c.bf16 %v283_v32, %v282_v31  ;;  %v284_v39 = vld [vmem:[%s2115_s27 + $0x20] sm:$0xff]  ;;  %v1225_v41 = vpack.c.bf16 %v179_v35, %v178_v34 }
  0xbd   :  { %1216 = vmatprep.subr.bf16.mxu0 %v1215_v15  ;;  %1241 = vmatpush3.bf16.msra.mxu1 %v1240_v30  ;;  %v285_v40 = vld [vmem:[%s2115_s27 + $0x28] sm:$0xff]  ;;  %v1227_v42 = vpack.c.bf16 %v197_v37, %v196_v36  ;;  %v180_v43 = vld [vmem:[%s2114_s3 + $0x50] sm:$0xff]  ;;  %v181_v44 = vld [vmem:[%s2114_s3 + $0x58] sm:$0xff] }
  0xbe   :  { %1242 = vmatprep.subr.bf16.mxu1 %v1576_v0  ;;  %v198_v45 = vld [vmem:[%s2114_s3 + $0xe0] sm:$0xff]  ;;  %v199_v46 = vld [vmem:[%s2114_s3 + $0xe8] sm:$0xff]  ;;  %v1246_v47 = vpack.c.bf16 %v285_v40, %v284_v39  ;;  %v286_v48 = vld [vmem:[%s2115_s27 + $0x30] sm:$0xff]  ;;  %v1229_v50 = vpack.c.bf16 %v181_v44, %v180_v43 }
  0xbf   :  { %v287_v49 = vld [vmem:[%s2115_s27 + $0x38] sm:$0xff]  ;;  %v1231_v51 = vpack.c.bf16 %v199_v46, %v198_v45  ;;  %v182_v52 = vld [vmem:[%s2114_s3 + $0x60] sm:$0xff]  ;;  %v183_v53 = vld [vmem:[%s2114_s3 + $0x68] sm:$0xff] }
  0xc0   :  { %1218 = vmatpush3.bf16.msra.mxu0 %v1217_v20  ;;  %v200_v54 = vld [vmem:[%s2114_s3 + $0xf0] sm:$0xff]  ;;  %v201_v55 = vld [vmem:[%s2114_s3 + $0xf8] sm:$0xff]  ;;  %v1249_v56 = vpack.c.bf16 %v287_v49, %v286_v48  ;;  %v288_v57 = vld [vmem:[%s2115_s27 + $0x40] sm:$0xff]  ;;  %v1233_v59 = vpack.c.bf16 %v183_v53, %v182_v52 }
  0xc1   :  { %1220 = vmatprep.subr.bf16.mxu0 %v1219_v21  ;;  %1244 = vmatpush3.bf16.msra.mxu1 %v1243_v38  ;;  %v289_v58 = vld [vmem:[%s2115_s27 + $0x48] sm:$0xff]  ;;  %v1235_v60 = vpack.c.bf16 %v201_v55, %v200_v54  ;;  %v184_v61 = vld [vmem:[%s2114_s3 + $0x70] sm:$0xff]  ;;  %v185_v62 = vld [vmem:[%s2114_s3 + $0x78] sm:$0xff] }
  0xc2   :  { %1245 = vmatprep.subr.bf16.mxu1 %v1576_v0  ;;  %v1252_v63 = vpack.c.bf16 %v289_v58, %v288_v57  ;;  %v290_v1 = vld [vmem:[%s2115_s27 + $0x50] sm:$0xff]  ;;  %v291_v2 = vld [vmem:[%s2115_s27 + $0x58] sm:$0xff]  ;;  %v1237_v3 = vpack.c.bf16 %v185_v62, %v184_v61  ;;  %v168_v5 = vld [vmem:[#allocation2] sm:$0xff] }
  0xc3   :  { %v1255_v4 = vpack.c.bf16 %v291_v2, %v290_v1  ;;  %v292_v6 = vld [vmem:[%s2115_s27 + $0x60] sm:$0xff]  ;;  %v293_v7 = vld [vmem:[%s2115_s27 + $0x68] sm:$0xff]  ;;  %v294_v9 = vld [vmem:[%s2115_s27 + $0x70] sm:$0xff] }
  0xc4   :  { %1222 = vmatpush3.bf16.msra.mxu0 %v1221_v29  ;;  %v1258_v8 = vpack.c.bf16 %v293_v7, %v292_v6  ;;  %v295_v10 = vld [vmem:[%s2115_s27 + $0x78] sm:$0xff]  ;;  %v374_v13 = vld [vmem:[%s2116_s21] sm:$0xff]  ;;  %v375_v14 = vld [vmem:[%s2116_s21 + $0x8] sm:$0xff] }
  0xc5   :  { %1224 = vmatprep.subr.bf16.mxu0 %v1223_v33  ;;  %1247 = vmatpush3.bf16.msra.mxu1 %v1246_v47  ;;  %v1261_v11 = vpack.c.bf16 %v295_v10, %v294_v9  ;;  %v376_v15 = vld [vmem:[%s2116_s21 + $0x10] sm:$0xff]  ;;  %v1264_v16 = vpack.c.bf16 %v375_v14, %v374_v13  ;;  %v377_v17 = vld [vmem:[%s2116_s21 + $0x18] sm:$0xff]  ;;  %v378_v19 = vld [vmem:[%s2116_s21 + $0x20] sm:$0xff] }
  0xc6   :  { %1248 = vmatprep.subr.bf16.mxu1 %v1576_v0  ;;  %v1267_v18 = vpack.c.bf16 %v377_v17, %v376_v15  ;;  %v379_v20 = vld [vmem:[%s2116_s21 + $0x28] sm:$0xff]  ;;  %v1006_v23 = vld [vmem:[#allocation5] ss:$0 sm:$0xff]  ;;  %v381_v29 = vld [vmem:[%s2116_s21 + $0x38] sm:$0xff] }
  0xc7   :  { %v1270_v21 = vpack.c.bf16 %v379_v20, %v378_v19  ;;  %v380_v28 = vld [vmem:[%s2116_s21 + $0x30] sm:$0xff]  ;;  %v464_v32 = vld [vmem:[%s2082_s7] sm:$0xff]  ;;  %v465_v33 = vld [vmem:[%s2082_s7 + $0x8] sm:$0xff] }
  0xc8   :  { %1226 = vmatpush3.bf16.msra.mxu0 %v1225_v41  ;;  %v1273_v30 = vpack.c.bf16 %v381_v29, %v380_v28  ;;  %v1007_v31 = vld [vmem:[#allocation7] ss:$0 sm:$0xff]  ;;  %v1276_v37 = vpack.c.bf16 %v465_v33, %v464_v32  ;;  %v467_v40 = vld [vmem:[%s2082_s7 + $0x18] sm:$0xff]  ;;  %v550_v43 = vld [vmem:[%s2084_s9 + $0x8] sm:$0xff] }
  0xc9   :  { %1228 = vmatprep.subr.bf16.mxu0 %v1227_v42  ;;  %1250 = vmatpush3.bf16.msra.mxu1 %v1249_v56  ;;  %v466_v39 = vld [vmem:[%s2082_s7 + $0x10] sm:$0xff]  ;;  %v549_v42 = vld [vmem:[%s2084_s9] sm:$0xff]  ;;  %v666_v6 = vld [vmem:[#allocation11 + $0x10] sm:$0xff] }
  0xca   :  { %1251 = vmatprep.subr.bf16.mxu1 %v1576_v0  ;;  %v1279_v41 = vpack.c.bf16 %v467_v40, %v466_v39  ;;  %v1282_v44 = vpack.c.bf16 %v550_v43, %v549_v42  ;;  %v1008_v45 = vld [vmem:[#allocation8] ss:$0 sm:$0xff]  ;;  %v1012_v54 = vld [vmem:[%s2085_s10] ss:$0 sm:$0xff]  ;;  %v780_v32 = vld [vmem:[#allocation13] sm:$0xff] }
  0xcb   :  { %v667_v7 = vld [vmem:[#allocation11 + $0x18] sm:$0xff]  ;;  %v1014_v14 = vld [vmem:[%s2092_s17] ss:$0 sm:$0xff] }
  0xcc   :  { %1230 = vmatpush3.bf16.msra.mxu0 %v1229_v50  ;;  %v1010_v50 = vld [vmem:[#allocation10] ss:$0 sm:$0xff]  ;;  %v1016_v19 = vld [vmem:[%s2087_s12] ss:$0 sm:$0xff] }
  0xcd   :  { %1232 = vmatprep.subr.bf16.mxu0 %v1231_v51  ;;  %1253 = vmatpush3.bf16.msra.mxu1 %v1252_v63  ;;  %v781_v33 = vld [vmem:[#allocation13 + $0x8] sm:$0xff]  ;;  %v787_v42 = vld [vmem:[#allocation13 + $0x38] sm:$0xff] }
  0xce   :  { %1254 = vmatprep.subr.bf16.mxu1 %v1576_v0  ;;  %v785_v39 = vld [vmem:[#allocation13 + $0x28] sm:$0xff] }
  0xd0   :  { %1234 = vmatpush3.bf16.msra.mxu0 %v1233_v59 }
  0xd1   :  { %1236 = vmatprep.subr.bf16.mxu0 %v1235_v60  ;;  %1256 = vmatpush3.bf16.msra.mxu1 %v1255_v4  ;;  %v665_v4 = vld [vmem:[#allocation11 + $0x8] sm:$0xff] }
  0xd2   :  { %1257 = vmatprep.subr.bf16.mxu1 %v1576_v0 }
  0xd4   :  { %1238 = vmatpush3.bf16.msra.mxu0 %v1237_v3  ;;  %v664_v3 = vld [vmem:[#allocation11] sm:$0xff] }
  0xd5   :  { %1263 = vmatprep.subr.bf16.mxu0 %v1576_v0  ;;  %1259 = vmatpush3.bf16.msra.mxu1 %v1258_v8  ;;  %v1288_v8 = vpack.c.bf16 %v667_v7, %v666_v6  ;;  %v886_v7 = vld [vmem:[#allocation14 + $0x80] sm:$0xff] }
  0xd6   :  { %1260 = vmatprep.subr.bf16.mxu1 %v1576_v0 }
  0xd7   :  { %274 = vmatmul.mubr.f32.vlgmr.msra.gmra.mrb[0].mxu0 %v168_v5  ;;  %v1285_v5 = vpack.c.bf16 %v665_v4, %v664_v3  ;;  %v887_v3 = vld [vmem:[#allocation14 + $0x88] sm:$0xff]  ;;  %v889_v4 = vld [vmem:[#allocation14 + $0x98] sm:$0xff] }
  0xd8   :  { %1156 = vmatprep.mubr.msk.f32.mxu0 %vm1577_vm0, %v1578_v12  ;;  %1265 = vmatpush3.bf16.msra.mxu0 %v1264_v16  ;;  %v1015_v16 = vld [vmem:[%s2093_s18] ss:$0 sm:$0xff]  ;;  %v1318_v6 = vpack.c.bf16 %v889_v4, %v887_v3 }
  0xd9   :  { %1262 = vmatpush3.bf16.msra.mxu1 %v1261_v11  ;;  %1266 = vmatprep.subr.bf16.mxu0 %v1576_v0 }
  0xda   :  { %1281 = vmatprep.subr.bf16.mxu1 %v1576_v0 }
  0xdc   :  { %1268 = vmatpush3.bf16.msra.mxu0 %v1267_v18 }
  0xdd   :  { %1269 = vmatprep.subr.bf16.mxu0 %v1576_v0 }
  0xe0   :  { %1271 = vmatpush3.bf16.msra.mxu0 %v1270_v21 }
  0xe1   :  { %1272 = vmatprep.subr.bf16.mxu0 %v1576_v0 }
  0xe4   :  { %1274 = vmatpush3.bf16.msra.mxu0 %v1273_v30 }
  0xe5   :  { %1275 = vmatprep.subr.bf16.mxu0 %v1576_v0 }
 0x1aa   :  { %v1054_v22 = vpop.f32.mrb[0].mxu0 }
 0x1ab   :  { %v1055_v24 = vpop.f32.mrb[1].mxu0 }
 0x1ac   :  { %v1056_v25 = vadd.f32 %v1055_v24, %v1054_v22 }
 0x1ae   :  { %v1971_v26 = vadd.f32 %v1056_v25, %v1006_v23 }
 0x1b0   :  { %v279_v27 = vmax.f32 %v1971_v26, 0.0 }
 0x1b2   :  { %1138 = vmatmul.mubr.f32.vlgmr.msra.gmra.mrb[0].mxu1 %v279_v27 }
 0x1b3   :  { %1174 = vmatprep.mubr.msk.f32.mxu1 %vm1577_vm0, %v1578_v12  ;;  %1283 = vmatpush3.bf16.msra.mxu1 %v1282_v44  ;;  %v871_v44 = vld [vmem:[#allocation14 + $0x8] sm:$0xff] }
 0x1b4   :  { %1284 = vmatprep.subr.bf16.mxu1 %v1576_v0 }
 0x285   :  { %v369_v34 = vpop.f32.mrb[0].mxu1 }
 0x286   :  { %v1991_v35 = vadd.f32 %v1007_v31, %v369_v34  ;;  %v1139_v36 = vpop.f32.mrb[1].mxu1  ;;  %v1291_v34 = vpack.c.bf16 %v781_v33, %v780_v32  ;;  %v896_v32 = vld [vmem:[#allocation14 + $0xd0] sm:$0xff] }
 0x287   :  { %v783_v36 = vld [vmem:[#allocation13 + $0x18] sm:$0xff] }
 0x288   :  { %v373_v38 = vmax.f32 %v1991_v35, 0.0  ;;  %v782_v35 = vld [vmem:[#allocation13 + $0x10] sm:$0xff] }
 0x28a   :  { %1157 = vmatmul.mubr.msk.f32.vlgmr.msra.gmra.mrb[2].mxu0 %vm389_vm1, %v373_v38 }
 0x28b   :  { %1277 = vmatpush3.bf16.msra.mxu0 %v1276_v37  ;;  %1167 = vmatprep.mubr.msk.f32.mxu0 %vm1577_vm0, %v1578_v12  ;;  %v1294_v37 = vpack.c.bf16 %v783_v36, %v782_v35  ;;  %v901_v35 = vld [vmem:[#allocation14 + $0xf8] sm:$0xff] }
 0x28c   :  { %1278 = vmatprep.subr.bf16.mxu0 %v1576_v0 }
 0x28f   :  { %1280 = vmatpush3.bf16.msra.mxu0 %v1279_v41  ;;  %v786_v41 = vld [vmem:[#allocation13 + $0x30] sm:$0xff] }
 0x290   :  { %1290 = vmatprep.subr.bf16.mxu0 %v1576_v0  ;;  %v1300_v43 = vpack.c.bf16 %v787_v42, %v786_v41 }
 0x35d   :  { %v459_v46 = vpop.f32.mrb[2].mxu0 }
 0x35e   :  { %v460_v47 = vadd.f32 %v1008_v45, %v459_v46  ;;  %v1158_v48 = vpop.f32.mrb[3].mxu0  ;;  %v873_v45 = vld [vmem:[#allocation14 + $0x18] sm:$0xff]  ;;  %v870_v46 = vld [vmem:[#allocation14] sm:$0xff] }
 0x35f   :  { %v872_v48 = vld [vmem:[#allocation14 + $0x10] sm:$0xff] }
 0x360   :  { %v463_v49 = vmax.f32 %v460_v47, 0.0  ;;  %v1302_v47 = vpack.c.bf16 %v873_v45, %v871_v44  ;;  %v904_v45 = vlaneseq }
 0x362   :  { %1168 = vmatmul.mubr.msk.f32.vlgmr.msra.gmra.mrb[4].mxu0 %vm475_vm2, %v463_v49 }
 0x363   :  { %1204 = vmatprep.mubr.msk.f32.mxu0 %vm1577_vm0, %v1578_v12  ;;  %1292 = vmatpush3.bf16.msra.mxu0 %v1291_v34  ;;  %v899_v34 = vld [vmem:[#allocation14 + $0xe8] sm:$0xff] }
 0x364   :  { %1293 = vmatprep.subr.bf16.mxu0 %v1576_v0  ;;  %v1330_v36 = vpack.c.bf16 %v901_v35, %v899_v34 }
 0x367   :  { %1295 = vmatpush3.bf16.msra.mxu0 %v1294_v37  ;;  %v898_v37 = vld [vmem:[#allocation14 + $0xe0] sm:$0xff] }
 0x368   :  { %1296 = vmatprep.subr.bf16.mxu0 %v1576_v0 }
 0x435   :  { %v545_v51 = vpop.f32.mrb[4].mxu0 }
 0x436   :  { %v546_v52 = vadd.f32 %v1010_v50, %v545_v51  ;;  %v1169_v53 = vpop.f32.mrb[5].mxu0  ;;  %v877_v50 = vld [vmem:[#allocation14 + $0x38] sm:$0xff]  ;;  %v1304_v51 = vpack.c.bf16 %v872_v48, %v870_v46  ;;  %v905_v46 = vshrl.u32 %v904_v45, 7  ;;  %v902_v48 = vld [vmem:[%s2091_s16] sm:$0x3] }
 0x437   :  { %v874_v53 = vld [vmem:[#allocation14 + $0x20] sm:$0xff] }
 0x438   :  { %1175 = vmatmul.mubr.msk.f32.vlgmr.msra.gmra.mrb[2].mxu1 %vm558_vm3, %v546_v52 }
 0x439   :  { %1185 = vmatprep.mubr.msk.f32.mxu1 %vm1577_vm0, %v1578_v12  ;;  %1286 = vmatpush3.bf16.msra.mxu1 %v1285_v5 }
 0x43a   :  { %1287 = vmatprep.subr.bf16.mxu1 %v1576_v0 }
 0x43d   :  { %1289 = vmatpush3.bf16.msra.mxu1 %v1288_v8  ;;  %v888_v8 = vld [vmem:[#allocation14 + $0x90] sm:$0xff] }
 0x43e   :  { %1303 = vmatprep.subr.bf16.mxu1 %v1302_v47  ;;  %v906_v47 = vsub.s32 0, %v905_v46 }
 0x50b   :  { %v628_v55 = vpop.f32.mrb[2].mxu1 }
 0x50c   :  { %v629_v56 = vadd.f32 %v1012_v54, %v628_v55  ;;  %v1176_v57 = vpop.f32.mrb[3].mxu1  ;;  %v876_v54 = vld [vmem:[#allocation14 + $0x30] sm:$0xff]  ;;  %v879_v55 = vld [vmem:[#allocation14 + $0x48] sm:$0xff] }
 0x50e   :  { %v632_v58 = vmax.f32 %v629_v56, 0.0  ;;  %v881_v56 = vld [vmem:[#allocation14 + $0x58] sm:$0xff] }
 0x50f   :  { %v1310_v57 = vpack.c.bf16 %v881_v56, %v879_v55 }
 0x510   :  { %v633_v59 = vadd.f32 %v632_v58, %v463_v49  ;;  %v875_v49 = vld [vmem:[#allocation14 + $0x28] sm:$0xff]  ;;  %v878_v58 = vld [vmem:[#allocation14 + $0x40] sm:$0xff] }
 0x511   :  { %v1306_v52 = vpack.c.bf16 %v877_v50, %v875_v49  ;;  %v910_v49 = vsub.s32 1, %v905_v46  ;;  %v907_v50 = vrot.slane %v902_v48, %v906_v47 }
 0x512   :  { %v634_v60 = vsel %vm475_vm2, %v633_v59, 0.0 }
 0x513   :  { %635 = vadd.xlane.f32.xlu0 %v634_v60  ;;  %v883_v60 = vld [vmem:[#allocation14 + $0x68] sm:$0xff] }
 0x5a0   :  { %v636_v61 = vpop.xlane.xlu0 %635 }
 0x5a1   :  { %v638_v62 = vmul.f32 0.03125, %v636_v61  ;;  %v885_v61 = vld [vmem:[#allocation14 + $0x78] sm:$0xff] }
 0x5a3   :  { %v639_v63 = vsub.f32 %v633_v59, %v638_v62  ;;  %v880_v59 = vld [vmem:[#allocation14 + $0x50] sm:$0xff] }
 0x5a4   :  { %v1312_v62 = vpack.c.bf16 %v880_v59, %v878_v58 }
 0x5a5   :  { %v640_v1 = vmul.f32 %v639_v63, %v639_v63 }
 0x5a7   :  { %v641_v2 = vsel %vm475_vm2, %v640_v1, 0.0  ;;  %v882_v1 = vld [vmem:[#allocation14 + $0x60] sm:$0xff] }
 0x5a8   :  { %642 = vadd.xlane.f32.xlu0 %v641_v2  ;;  %v884_v2 = vld [vmem:[#allocation14 + $0x70] sm:$0xff] }
 0x5a9   :  { %v1316_v5 = vpack.c.bf16 %v884_v2, %v882_v1 }
 0x635   :  { %v643_v9 = vpop.xlane.xlu0 %642 }
 0x636   :  { %v644_v10 = vmul.f32 0.03125, %v643_v9  ;;  %v891_v9 = vld [vmem:[#allocation14 + $0xa8] sm:$0xff] }
 0x638   :  { %v645_v11 = vadd.f32 1e-05, %v644_v10  ;;  %v893_v10 = vld [vmem:[#allocation14 + $0xb8] sm:$0xff] }
 0x63a   :  { %1350 = vrsqrt.f32 %v645_v11  ;;  %v1320_v11 = vpack.c.bf16 %v888_v8, %v886_v7 }
 0x644   :  { %v1351_v13 = vpop.eup %1350 }
 0x645   :  { %v647_v15 = vmul.f32 %v1351_v13, %v639_v63  ;;  %v1314_v63 = vpack.c.bf16 %v885_v61, %v883_v60  ;;  %v1322_v13 = vpack.c.bf16 %v893_v10, %v891_v9 }
 0x647   :  { %v655_v17 = vmul.f32 %v1014_v14, %v647_v15  ;;  %v890_v14 = vld [vmem:[#allocation14 + $0xa0] sm:$0xff]  ;;  %v892_v15 = vld [vmem:[#allocation14 + $0xb0] sm:$0xff] }
 0x649   :  { %v663_v18 = vadd.f32 %v1015_v16, %v655_v17  ;;  %v895_v16 = vld [vmem:[#allocation14 + $0xc8] sm:$0xff]  ;;  %v897_v17 = vld [vmem:[#allocation14 + $0xd8] sm:$0xff] }
 0x64b   :  { %1186 = vmatmul.mubr.msk.f32.vlgmr.msra.gmra.mrb[4].mxu1 %vm475_vm2, %v663_v18  ;;  %v1324_v18 = vpack.c.bf16 %v892_v15, %v890_v14 }
 0x64c   :  { %978 = vmatprep.mubr.f32.mxu1 %v1578_v12  ;;  %1305 = vmatpush1.bf16.msra.mxu1 %v1304_v51  ;;  %v911_v51 = vrot.slane %v902_v48, %v910_v49 }
 0x64d   :  { %1307 = vmatprep.subr.bf16.mxu1 %v1306_v52 }
 0x71e   :  { %v744_v20 = vpop.f32.mrb[4].mxu1 }
 0x71f   :  { %v745_v21 = vadd.f32 %v1016_v19, %v744_v20  ;;  %v1187_v22 = vpop.f32.mrb[5].mxu1  ;;  %v1326_v19 = vpack.c.bf16 %v897_v17, %v895_v16 }
 0x721   :  { %v748_v23 = vmax.f32 %v745_v21, 0.0 }
 0x723   :  { %v749_v24 = vadd.f32 %v748_v23, %v373_v38  ;;  %v784_v38 = vld [vmem:[#allocation13 + $0x20] sm:$0xff] }
 0x724   :  { %v1297_v40 = vpack.c.bf16 %v785_v39, %v784_v38  ;;  %v900_v38 = vld [vmem:[#allocation14 + $0xf0] sm:$0xff] }
 0x725   :  { %v750_v25 = vsel %vm389_vm1, %v749_v24, 0.0  ;;  %v1332_v39 = vpack.c.bf16 %v900_v38, %v898_v37 }
 0x726   :  { %751 = vadd.xlane.f32.xlu1 %v750_v25  ;;  %1298 = vmatpush3.bf16.msra.mxu0 %v1297_v40 }
 0x727   :  { %1299 = vmatprep.subr.bf16.mxu0 %v1576_v0  ;;  %v1308_v0 = vpack.c.bf16 %v876_v54, %v874_v53 }
 0x729   :  { %1309 = vmatpush1.bf16.msra.mxu1 %v1308_v0 }
 0x72a   :  { %1301 = vmatpush3.bf16.msra.mxu0 %v1300_v43  ;;  %1311 = vmatprep.subr.bf16.mxu1 %v1310_v57 }
 0x72d   :  { %1313 = vmatpush1.bf16.msra.mxu1 %v1312_v62 }
 0x72e   :  { %1315 = vmatprep.subr.bf16.mxu1 %v1314_v63 }
 0x731   :  { %1317 = vmatpush1.bf16.msra.mxu1 %v1316_v5 }
 0x732   :  { %1319 = vmatprep.subr.bf16.mxu1 %v1318_v6 }
 0x735   :  { %1321 = vmatpush1.bf16.msra.mxu1 %v1320_v11 }
 0x736   :  { %1323 = vmatprep.subr.bf16.mxu1 %v1322_v13 }
 0x739   :  { %1325 = vmatpush1.bf16.msra.mxu1 %v1324_v18 }
 0x73a   :  { %1327 = vmatprep.subr.bf16.mxu1 %v1326_v19 }
 0x7b3   :  { %v752_v28 = vpop.xlane.xlu1 %751 }
 0x7b4   :  { %v754_v29 = vmul.f32 0.015625, %v752_v28  ;;  %v1019_v28 = vld [vmem:[%s2095_s20] ss:$0 sm:$0xff] }
 0x7b6   :  { %v2039_v30 = vsub.f32 %v749_v24, %v754_v29  ;;  %v1018_v24 = vld [vmem:[%s2094_s19] ss:$0 sm:$0xff] }
 0x7b8   :  { %v756_v12 = vmul.f32 %v2039_v30, %v2039_v30 }
 0x7ba   :  { %v757_v31 = vsel %vm389_vm1, %v756_v12, 0.0 }
 0x7bb   :  { %758 = vadd.xlane.f32.xlu1 %v757_v31  ;;  %v894_v31 = vld [vmem:[#allocation14 + $0xc0] sm:$0xff] }
 0x7bc   :  { %v1328_v33 = vpack.c.bf16 %v896_v32, %v894_v31 }
 0x7be   :  { %1329 = vmatpush1.bf16.msra.mxu1 %v1328_v33 }
 0x7bf   :  { %1331 = vmatprep.subr.bf16.mxu1 %v1330_v36 }
 0x7c2   :  { %1333 = vmatpush1.bf16.msra.mxu1 %v1332_v39 }
 0x848   :  { %v759_v20 = vpop.xlane.xlu1 %758 }
 0x849   :  { %v760_v21 = vmul.f32 0.015625, %v759_v20 }
 0x84b   :  { %v761_v22 = vadd.f32 1e-05, %v760_v21 }
 0x84d   :  { %1352 = vrsqrt.f32 %v761_v22 }
 0x857   :  { %v1353_v23 = vpop.eup %1352 }
 0x858   :  { %v763_v25 = vmul.f32 %v1353_v23, %v2039_v30  ;;  %v1020_v30 = vld [vmem:[%s2089_s14] ss:$0 sm:$0xff]  ;;  %s993_s14 = sshll.u32 %s1579_s11, 4  ;;  %s994_s14 = int_to_ptr.vmem [resolvable:$true] %s993_s14 }
 0x859   :  { %s1530_s22 = scalar_lea.vmem %s994_s14, 256  ;;  %p1535_p9 = scmp.lt.s32.totalorder %s994_s14, %s994_s14 }
 0x85a   :  { %v771_v29 = vmul.f32 %v1018_v24, %v763_v25  ;;  %p1531_p8 = scmp.ne.s32.totalorder %s994_s14, %s1530_s22  ;;  %p1536_p10 = scmp.lt.s32.totalorder %s1530_s22, %s1530_s22 }
 0x85c   :  { %v779_v12 = vadd.f32 %v1019_v28, %v771_v29  ;;  %p1537_p11 = por %p1536_p10, %p1535_p9 }
 0x85e   :  { %1205 = vmatmul.mubr.msk.f32.vlgmr.msra.gmra.mrb[6].mxu0 %vm389_vm1, %v779_v12  ;;  %p1538_p12 = pnand %p1537_p11, %p1531_p8 }
 0x931   :  { %v864_v40 = vpop.f32.mrb[6].mxu0 }
 0x932   :  { %v865_v41 = vadd.f32 %v1020_v30, %v864_v40  ;;  %v1206_v42 = vpop.f32.mrb[7].mxu0 }
 0x934   :  { %v868_v43 = vmax.f32 %v865_v41, 0.0 }
 0x936   :  { %v869_v44 = vadd.f32 %v868_v43, %v279_v27 }
 0x938   :  { %979 = vmatmul.mubr.f32.vlgmr.msra.gmra.mrb[6].mxu1 %v869_v44 }
 0xa0b   :  { %v980_v52 = vpop.f32.mrb[6].mxu1 }
 0xa0c   :  { %v981_v53 = vadd.f32 %v980_v52, %v907_v50  ;;  %v982_v54 = vpop.f32.mrb[7].mxu1 }
 0xa0d   :  { %v983_v55 = vadd.f32 %v982_v54, %v911_v51 }
 0xa0e   :  { %985 = vst [vmem:[#allocation16] sm:$0xff] %v981_v53 }
 0xa0f   :  { %986 = vst [vmem:[#allocation16 + $0x8] sm:$0xff] %v983_v55 }
 0xa10   :  { %1541 = shalt.err (!%p1538_p12)
}
 0xa11   :  { %s2117_s13 = sld [smem:[#allocation29_spill]] }
 0xa17   :  { %s1542_s6 = scalar_lea.hbm %s2117_s13, 256 }
 0xa18   :  { %p1543_p13 = scmp.ne.s32.totalorder %s2117_s13, %s1542_s6  ;;  %p1546_p0 = scmp.lt.u32.totalorder %s1542_s6, %s2117_s13 }
 0xa1a   :  { %p1548_p1 = pnand %p1546_p0, %p1543_p13 }
 0xa1c   :  { %1551 = shalt.err (!%p1548_p1)
}
 0xa1d   :  { %996 = dma.vmem_to_hbm [thread:$0]  %s994_s14, 256, %s2117_s13, [#allocation4]  }
 0xa1e   :  { %1562 = dma.done.wait [#allocation4], 256  }
 0xa1f   :  { %1563 = vsyncadd [#allocation4], 4294967040 }
 0xa20   :  { %1000 = vsyncpa [#allocation3], 1 }
 0xa21   :  { %1001 = vsyncpa [#allocation6], 1 }
 0xa22   :  { %1002 = vsyncpa [#allocation9], 1 }
 0xa23   :  { %1003 = vsyncpa [#allocation12], 1 }
 0xa24   :  { %1004 = vsyncpa [#allocation15], 1 }
 0xa25   :  { %1005 = vsyncpa [#allocation4], 1 }

</bundles_post_ra>
